<compile_context>
chip_gen: v7x
topology: tpu7x:2x2x1
jax: 0.10.0
libtpu: 0.0.40
codegen_flags: <defaults>
</compile_context>

<pallas_src>
import jax
import jax.numpy as jnp
from jax.experimental import pallas as pl
from jax.experimental.pallas import tpu as pltpu


def _attn_classifier_kernel(hs_ref, ids_ref, wa_ref, wf_ref, bf_ref, out_ref):
    # hs_ref : (1, S, H)   hidden states for this batch row
    # ids_ref: (1, S, 1)   int32 token ids (0 == padding -> masked)
    # wa_ref : (1, H)      attention projection weight (Linear(H, 1).weight)
    # wf_ref : (H, C)      classifier weight, pre-transposed (lane-dense C)
    # bf_ref : (1, C)      classifier bias
    # out_ref: (1, 1, C)   logits
    hs = hs_ref[0].astype(jnp.float32)                         # (S, H)
    wa = wa_ref[...].astype(jnp.float32)                       # (1, H)

    # q[i] = <hs[i, :], wa>  -- VPU multiply + lane reduce, no (S,H) temp kept live.
    q = jnp.sum(hs * wa, axis=-1, keepdims=True)               # (S, 1)

    # masked_fill(input_ids == 0, -inf)
    ids = ids_ref[0]                                           # (S, 1) int32
    q = jnp.where(ids == 0, -jnp.inf, q)                       # (S, 1)

    # softmax over the sequence (sublane) axis.
    # TODO(synk): if S is ever tiled across grid steps, switch to an online
    # (streaming) max/sum-exp like flash-softmax; this single pass needs full S.
    m = jnp.max(q, axis=0, keepdims=True)                      # (1, 1)
    e = jnp.exp(q - m)                                         # (S, 1)
    denom = jnp.sum(e, axis=0, keepdims=True)                  # (1, 1)
    w = e / denom                                              # (S, 1)

    # Attention-pooled hidden state: h = w^T @ hs  (sublane reduce).
    h = jnp.sum(w * hs, axis=0, keepdims=True)                 # (1, H)

    # Classifier head: (1, H) @ (H, C) + (1, C) on the MXU, f32 accumulate.
    logits = jnp.dot(h, wf_ref[...].astype(jnp.float32),
                     preferred_element_type=jnp.float32)
    logits = logits + bf_ref[...].astype(jnp.float32)          # (1, C)
    out_ref[0] = logits.astype(out_ref.dtype)                  # (1, C) view of (1,1,C)


def attention_classifier(hidden_states, input_ids, attn_w, fc_w, fc_b):
    """hidden_states: (B, S, H); input_ids: (B, S) int; attn_w: (1, H);
    fc_w: (C, H); fc_b: (C,).  Returns (B, C) f32 logits."""
    B, S, H = hidden_states.shape
    C = fc_w.shape[0]

    ids3d = input_ids.astype(jnp.int32).reshape(B, S, 1)   # lane-wise compare vs 0
    wa = attn_w.reshape(1, H)
    wf = jnp.transpose(fc_w)                               # (H, C) lane-dense output
    bf = fc_b.reshape(1, C)

    out = pl.pallas_call(
        _attn_classifier_kernel,
        out_shape=jax.ShapeDtypeStruct((B, 1, C), jnp.float32),
        grid=(B,),
        in_specs=[
            pl.BlockSpec((1, S, H), lambda b: (b, 0, 0)),  # hidden tile, pipelined
            pl.BlockSpec((1, S, 1), lambda b: (b, 0, 0)),  # id tile, same stage
            pl.BlockSpec((1, H), lambda b: (0, 0)),        # resident weights
            pl.BlockSpec((H, C), lambda b: (0, 0)),
            pl.BlockSpec((1, C), lambda b: (0, 0)),
        ],
        out_specs=pl.BlockSpec((1, 1, C), lambda b: (b, 0, 0)),
        compiler_params=pltpu.CompilerParams(
            dimension_semantics=("parallel",)),
    )(hidden_states, ids3d, wa, wf, bf)
    return out.reshape(B, C)


def _reference(hidden_states, input_ids, attn_w, fc_w, fc_b):
    hs = hidden_states.astype(jnp.float32)
    q = jnp.einsum("bsh,h->bs", hs, attn_w.astype(jnp.float32)[0])
    q = jnp.where(input_ids == 0, -jnp.inf, q)
    w = jax.nn.softmax(q, axis=-1)
    h = jnp.einsum("bs,bsh->bh", w, hs)
    return h @ fc_w.astype(jnp.float32).T + fc_b.astype(jnp.float32)


if __name__ == "__main__":
    key = jax.random.PRNGKey(0)
    k_hs, k_ids, k_wa, k_wf, k_bf = jax.random.split(key, 5)

    B, S, H, C = 2, 8, 32, 4
    hidden_states = jax.random.normal(k_hs, (B, S, H), dtype=jnp.float32)
    # Some zeros (padding) but guarantee at least one real token per row.
    input_ids = jax.random.randint(k_ids, (B, S), 0, 5, dtype=jnp.int32)
    input_ids = input_ids.at[:, 0].set(1)

    attn_w = jax.random.normal(k_wa, (1, H), dtype=jnp.float32) * 0.1
    fc_w = jax.random.normal(k_wf, (C, H), dtype=jnp.float32) * 0.1
    fc_b = jax.random.normal(k_bf, (C,), dtype=jnp.float32) * 0.1

    out = attention_classifier(hidden_states, input_ids, attn_w, fc_w, fc_b)
    jax.block_until_ready(out)

    ref = _reference(hidden_states, input_ids, attn_w, fc_w, fc_b)
    assert out.shape == (B, C), out.shape
    assert jnp.allclose(out, ref, atol=1e-5, rtol=1e-5), (out, ref)
    print("KERNEL_OK")
</pallas_src>

<mosaic_0001>
module attributes {stable_mosaic.version = 11 : i64} {
  func.func @_attn_classifier_kernel(%arg0: i32, %arg1: memref<1x8x32xf32, #tpu.memory_space<vmem>>, %arg2: memref<1x8x1xi32, #tpu.memory_space<vmem>>, %arg3: memref<1x32xf32, #tpu.memory_space<vmem>>, %arg4: memref<32x4xf32, #tpu.memory_space<vmem>>, %arg5: memref<1x4xf32, #tpu.memory_space<vmem>>, %arg6: memref<1x1x4xf32, #tpu.memory_space<vmem>>) attributes {dimension_semantics = [#tpu.dimension_semantics<parallel>], iteration_bounds = array<i64: 2>, scalar_prefetch = 0 : i64, scratch_operands = 0 : i64, tpu.core_type = #tpu.core_type<tc>, window_params = [{transform_indices = @transform_0, window_bounds = array<i64: 1, 8, 32>}, {transform_indices = @transform_1, window_bounds = array<i64: 1, 8, 1>}, {pipeline_mode = #tpu.pipeline_mode<synchronous>, transform_indices = @transform_2, window_bounds = array<i64: 1, 32>}, {pipeline_mode = #tpu.pipeline_mode<synchronous>, transform_indices = @transform_3, window_bounds = array<i64: 32, 4>}, {pipeline_mode = #tpu.pipeline_mode<synchronous>, transform_indices = @transform_4, window_bounds = array<i64: 1, 4>}, {transform_indices = @transform_5, window_bounds = array<i64: 1, 1, 4>}]} {
    %c0 = arith.constant 0 : index
    %c0_0 = arith.constant 0 : index
    %c0_1 = arith.constant 0 : index
    %0 = vector.load %arg1[%c0, %c0_0, %c0_1] : memref<1x8x32xf32, #tpu.memory_space<vmem>>, vector<1x8x32xf32>
    %1 = vector.shape_cast %0 : vector<1x8x32xf32> to vector<8x32xf32>
    %c0_2 = arith.constant 0 : index
    %c0_3 = arith.constant 0 : index
    %2 = vector.load %arg3[%c0_2, %c0_3] : memref<1x32xf32, #tpu.memory_space<vmem>>, vector<1x32xf32>
    %3 = vector.broadcast %2 : vector<1x32xf32> to vector<8x32xf32>
    %4 = arith.mulf %1, %3 : vector<8x32xf32>
    %cst = arith.constant dense<0.000000e+00> : vector<8xf32>
    %5 = vector.multi_reduction <add>, %4, %cst [1] : vector<8x32xf32> to vector<8xf32>
    %6 = vector.shape_cast %5 : vector<8xf32> to vector<8x1xf32>
    %c0_4 = arith.constant 0 : index
    %c0_5 = arith.constant 0 : index
    %c0_6 = arith.constant 0 : index
    %7 = vector.load %arg2[%c0_4, %c0_5, %c0_6] : memref<1x8x1xi32, #tpu.memory_space<vmem>>, vector<1x8x1xi32>
    %8 = vector.shape_cast %7 : vector<1x8x1xi32> to vector<8x1xi32>
    %c0_i32 = arith.constant 0 : i32
    %9 = vector.broadcast %c0_i32 : i32 to vector<8x1xi32>
    %10 = arith.cmpi eq, %8, %9 : vector<8x1xi32>
    %cst_7 = arith.constant 0xFF800000 : f32
    %11 = vector.broadcast %cst_7 : f32 to vector<8x1xf32>
    %12 = arith.select %10, %11, %6 : vector<8x1xi1>, vector<8x1xf32>
    %cst_8 = arith.constant dense<0xFF800000> : vector<1xf32>
    %13 = vector.multi_reduction <maximumf>, %12, %cst_8 [0] : vector<8x1xf32> to vector<1xf32>
    %14 = vector.shape_cast %13 : vector<1xf32> to vector<1x1xf32>
    %15 = vector.broadcast %14 : vector<1x1xf32> to vector<8x1xf32>
    %16 = arith.subf %12, %15 : vector<8x1xf32>
    %17 = math.exp %16 : vector<8x1xf32>
    %cst_9 = arith.constant dense<0.000000e+00> : vector<1xf32>
    %18 = vector.multi_reduction <add>, %17, %cst_9 [0] : vector<8x1xf32> to vector<1xf32>
    %19 = vector.shape_cast %18 : vector<1xf32> to vector<1x1xf32>
    %20 = vector.broadcast %19 : vector<1x1xf32> to vector<8x1xf32>
    %21 = arith.divf %17, %20 : vector<8x1xf32>
    %22 = vector.broadcast %21 : vector<8x1xf32> to vector<8x32xf32>
    %23 = arith.mulf %22, %1 : vector<8x32xf32>
    %cst_10 = arith.constant dense<0.000000e+00> : vector<32xf32>
    %24 = vector.multi_reduction <add>, %23, %cst_10 [0] : vector<8x32xf32> to vector<32xf32>
    %25 = vector.shape_cast %24 : vector<32xf32> to vector<1x32xf32>
    %c0_11 = arith.constant 0 : index
    %c0_12 = arith.constant 0 : index
    %26 = vector.load %arg4[%c0_11, %c0_12] : memref<32x4xf32, #tpu.memory_space<vmem>>, vector<32x4xf32>
    %cst_13 = arith.constant dense<0.000000e+00> : vector<1x4xf32>
    %27 = tpu.matmul %25, %26, %cst_13 {dimension_numbers = #tpu.dot_dimension_numbers<[1], [0], [0], [1], [0, 0, 1, 1], [], []>} : vector<1x32xf32>, vector<32x4xf32>, vector<1x4xf32> -> vector<1x4xf32>
    %c0_14 = arith.constant 0 : index
    %c0_15 = arith.constant 0 : index
    %28 = vector.load %arg5[%c0_14, %c0_15] : memref<1x4xf32, #tpu.memory_space<vmem>>, vector<1x4xf32>
    %29 = arith.addf %27, %28 : vector<1x4xf32>
    %c0_16 = arith.constant 0 : index
    %c0_17 = arith.constant 0 : index
    %c0_18 = arith.constant 0 : index
    %30 = vector.load %arg6[%c0_16, %c0_17, %c0_18] : memref<1x1x4xf32, #tpu.memory_space<vmem>>, vector<1x1x4xf32>
    %31 = vector.shape_cast %30 : vector<1x1x4xf32> to vector<1x4xf32>
    %32 = vector.shape_cast %29 : vector<1x4xf32> to vector<1x1x4xf32>
    tpu.vector_store %arg6[%c0_16, %c0_17, %c0_18], %32 {strides = array<i32>} : memref<1x1x4xf32, #tpu.memory_space<vmem>>, vector<1x1x4xf32>,
    return
  }
  func.func @transform_0(%arg0: i32) -> (i32, i32, i32) {
    %c0_i32 = arith.constant 0 : i32
    %c0_i32_0 = arith.constant 0 : i32
    %c0_i32_1 = arith.constant 0 : i32
    return %arg0, %c0_i32, %c0_i32_0 : i32, i32, i32
  }
  func.func @transform_1(%arg0: i32) -> (i32, i32, i32) {
    %c0_i32 = arith.constant 0 : i32
    %c0_i32_0 = arith.constant 0 : i32
    %c0_i32_1 = arith.constant 0 : i32
    return %arg0, %c0_i32, %c0_i32_0 : i32, i32, i32
  }
  func.func @transform_2(%arg0: i32) -> (i32, i32) {
    %c0_i32 = arith.constant 0 : i32
    %c0_i32_0 = arith.constant 0 : i32
    %c0_i32_1 = arith.constant 0 : i32
    return %c0_i32, %c0_i32_0 : i32, i32
  }
  func.func @transform_3(%arg0: i32) -> (i32, i32) {
    %c0_i32 = arith.constant 0 : i32
    %c0_i32_0 = arith.constant 0 : i32
    %c0_i32_1 = arith.constant 0 : i32
    return %c0_i32, %c0_i32_0 : i32, i32
  }
  func.func @transform_4(%arg0: i32) -> (i32, i32) {
    %c0_i32 = arith.constant 0 : i32
    %c0_i32_0 = arith.constant 0 : i32
    %c0_i32_1 = arith.constant 0 : i32
    return %c0_i32, %c0_i32_0 : i32, i32
  }
  func.func @transform_5(%arg0: i32) -> (i32, i32, i32) {
    %c0_i32 = arith.constant 0 : i32
    %c0_i32_0 = arith.constant 0 : i32
    %c0_i32_1 = arith.constant 0 : i32
    return %arg0, %c0_i32, %c0_i32_0 : i32, i32, i32
  }
}

</mosaic_0001>

<bundles_post_ra>
// kernel: tpu_custom_call.1
= control target key start
LH: loop header
LB: loop body
LE: loop exit
PB: predicated region body
PF: predicated region fallthrough
CT: control target
= control target key end

     0   :  { %10 = vsyncpa [#allocation3], 0  ;;  %s749_s0 = inlined_call_operand.vmem [shape: f32[2,8,32], index: 0, kind: input, shape index: {}]   ;;  %s750_s1 = inlined_call_operand.vmem [shape: s32[2,8,1], index: 1, kind: input, shape index: {}]   ;;  %s751_s2 = inlined_call_operand.vmem [shape: f32[1,32], index: 2, kind: input, shape index: {}]   ;;  %s752_s3 = inlined_call_operand.vmem [shape: f32[32,4], index: 3, kind: input, shape index: {}]   ;;  %s753_s4 = inlined_call_operand.vmem [shape: f32[1,4], index: 4, kind: input, shape index: {}]   ;;  %s754_s5 = inlined_call_operand.hbm [shape: f32[2,1,4], index: 5, kind: output, shape index: {}]  }
   0x1   :  { %12 = vsyncpa [#allocation3 + $0x1], 0  ;;  %s625_s18 = smov 0   ;;  %s627_s19 = smov 0  }
   0x2   :  { %s629_s20 = smov 0   ;;  %s631_s21 = smov 0  }
   0x3 LB: > { %s646_s22 = sadd.s32 4294967295, %s588_s21   ;;  %s445_s23 = sadd.s32 4294967294, %s588_s21   ;;  %s588_s21 = sphi %s631_s21, %s760_s21   ;;  %s584_s20 = sphi %s629_s20, %s759_s20   ;;  %s580_s19 = sphi %s627_s19, %s758_s19   ;;  %s576_s18 = sphi %s625_s18, %s757_s18  }
   0x4   : > { %s650_s24 = sadd.s32 1, %s588_s21   ;;  %s140_s25 = sadd.s32 1, %s584_s20 }
   0x5   : > { %s137_s26 = ssub.s32 %s588_s21, %s650_s24  ;;  %p150_p0 = scmp.ne.s32.totalorder %s584_s20, %s580_s19 }
   0x6   : > { %p138_p1 = scmp.eq.s32.totalorder %s137_s26, 0  ;;  %p151_p2 = scmp.eq.s32.totalorder %s646_s22, 1 }
   0x7   : > { %p156_p3 = scmp.ne.s32.totalorder %s580_s19, %s576_s18  ;;  %p157_p4 = scmp.eq.s32.totalorder %s445_s23, 1 }
   0x8   : > { %s661_s27 = scalar_select %p138_p1, %s584_s20, %s140_s25  }
   0x9   : > { %p663_p5 = por %p151_p2, %p150_p0  ;;  %p667_p6 = por %p157_p4, %p156_p3 }
   0xa   : > { %p448_p7 = scmp.ge.s32.totalorder %s588_s21, 1  ;;  %p198_p8 = scmp.lt.s32.totalorder %s588_s21, 3 }
   0xc   : > { %p199_p9 = pnand %p448_p7, %p198_p8 }
   0xd   : > { %p228_p10 = scmp.lt.s32.totalorder (!%p199_p9), %s646_s22, 1  ;;  %v451_v0 = vld [vmem:[%s751_s2] ss:$0 sm:$0xff] (!%p199_p9)  ;;  %vm245_vm0 = vcmask (!%p199_p9), 261120   ;;  %v590_v4 = vmov (!%p199_p9), 0   ;;  %vm252_vm2 = vcmask (!%p199_p9), 7168  }
   0xe   : > { %202 = sbr.rel (%p199_p9) target bundleno = 597 (0x255), region = 40  ;;  %521 = vset.pattern.permute.xlu0 (!%p199_p9), %v590_v4  ;;  %v285_v27 = vld [vmem:[%s752_s3] sm:$0xff] (!%p199_p9)  ;;  %v286_v28 = vld [vmem:[%s752_s3 + $0x8] sm:$0xff] (!%p199_p9)  ;;  %v591_v30 = vmov (!%p199_p9), 0.0|0.0   ;;  %v287_v31 = vld [vmem:[%s752_s3 + $0x10] sm:$0xff] (!%p199_p9)  ;;  %vm592_vm3 = vmmov (!%p199_p9), 0  }
   0xf   : > { %v473_v29 = vpack.c.bf16 (!%p199_p9), %v286_v28, %v285_v27  ;;  %472 = vmatprep.subr.bf16.mxu0 (!%p199_p9), %v591_v30  ;;  %v288_v32 = vld [vmem:[%s752_s3 + $0x18] sm:$0xff] (!%p199_p9)  ;;  %v593_v34 = vmov (!%p199_p9), 0.0   ;;  %s226_s7 = sand.u32 (!%p199_p9), 1, %s580_s19   ;;  %v289_v44 = vld [vmem:[%s753_s4] sm:$0x1] (!%p199_p9)  ;;  %s453_s10 = sshll.u32 (!%p199_p9), %s646_s22, 4 }
  0x10   : > { %v476_v33 = vpack.c.bf16 (!%p199_p9), %v288_v32, %v287_v31  ;;  %469 = vmatprep.mubr.msk.f32.mxu0 (!%p199_p9), %vm592_vm3, %v593_v34  ;;  %vm363_vm4 = vcmask (!%p199_p9), 24576   ;;  %s707_s15 = scalar_lea.hbm (!%p199_p9), %s754_s5, %s453_s10  ;;  %s366_s16 = scalar_lea.sflag (!%p199_p9), [#allocation3], %s226_s7 }
  0x11   : > { %474 = vmatpush3.bf16.msra.mxu0 (!%p199_p9), %v473_v29 }
  0x12   : > { %475 = vmatprep.subr.bf16.mxu0 (!%p199_p9), %v591_v30 }
  0x15   : > { %s229_s30 = scalar_select %p228_p10, %s646_s22, 1  ;;  %477 = vmatpush3.bf16.msra.mxu0 %v476_v33 }
  0x16   : > { %s594_s22 = smov [#allocation2]  }
  0x17   : > { %s449_s6 = sshll.u32 %s229_s30, 3  ;;  %s530_s23 = sshll.u32 %s594_s22, 4  ;;  %s531_s23 = int_to_ptr.vmem [resolvable:$false] %s530_s23 }
  0x18   : > { %s231_s11 = scalar_lea.vmem %s749_s0, %s449_s6  ;;  %s235_s14 = scalar_lea.vmem %s750_s1, %s449_s6 }
  0x19   : > { %v236_v1 = vld [vmem:[%s231_s11] sm:$0xff]  ;;  %s227_s11 = scalar_lea.vmem [#allocation2], %s226_s7  ;;  %s532_s25 = scalar_lea.vmem %s531_s23, 32 }
  0x1a   : > { %v244_v2 = vmul.f32 %v451_v0, %v236_v1  ;;  %v249_v5 = vld [vmem:[%s235_s14] sm:$0xff]  ;;  %s378_s12 = sshll.u32 %s227_s11, 4  ;;  %s709_s12 = int_to_ptr.vmem [resolvable:$true] %s378_s12 }
  0x1b   : > { %vm250_vm1 = vcmp.eq.s32.totalorder %v249_v5, 0  ;;  %s526_s17 = scalar_lea.vmem %s709_s12, 16  ;;  %p533_p0 = scmp.lt.s32.totalorder %s709_s12, %s531_s23 }
  0x1c   : > { %v246_v3 = vsel %vm245_vm0, %v244_v2, 0.0  ;;  %p527_p11 = scmp.ne.s32.totalorder %s709_s12, %s526_s17  ;;  %p534_p1 = scmp.lt.s32.totalorder %s532_s25, %s526_s17 }
  0x1d   : > { %247 = vadd.xlane.f32.xlu0 %v246_v3 }
  0x1e   : > { %p528_p12 = pnand %p527_p11, %p663_p5  ;;  %p535_p2 = por %p534_p1, %p533_p0 }
  0x20   : > { %p529_p13 = pneg %p528_p12 }
  0x22   : > { %p536_p3 = pnand %p535_p2, %p529_p13 }
  0xaa   : > { %v248_v6 = vpop.xlane.xlu0 %247 }
  0xab   : > { %v251_v7 = vsel %vm250_vm1, -inf, %v248_v6 }
  0xac   : > { %v253_v8 = vsel %vm252_vm2, %v251_v7, -inf }
  0xad   : > { %v254_v9 = vrot.slane %v253_v8, 4 }
  0xaf   : > { %v255_v10 = vmax.f32 %v253_v8, %v254_v9 }
  0xb1   : > { %v256_v11 = vrot.slane %v255_v10, 2 }
  0xb3   : > { %v257_v12 = vmax.f32 %v255_v10, %v256_v11 }
  0xb5   : > { %v258_v13 = vrot.slane %v257_v12, 1 }
  0xb7   : > { %v259_v14 = vmax.f32 %v257_v12, %v258_v13 }
  0xb9   : > { %v260_v15 = vsub.f32 %v251_v7, %v259_v14 }
  0xbb   : > { %v261_v16 = vmul.f32 1.442695, %v260_v15 }
  0xbd   : > { %522 = vpow2.f32 %v261_v16 }
  0xc7   : > { %v523_v17 = vpop.eup %522 }
  0xc8   : > { %v263_v18 = vsel %vm252_vm2, %v523_v17, 0.0 }
  0xc9   : > { %v264_v19 = vrot.slane %v263_v18, 4 }
  0xcb   : > { %v265_v20 = vadd.f32 %v264_v19, %v263_v18 }
  0xcd   : > { %v266_v21 = vrot.slane %v265_v20, 2 }
  0xcf   : > { %v267_v22 = vadd.f32 %v266_v21, %v265_v20 }
  0xd1   : > { %v268_v23 = vrot.slane %v267_v22, 1 }
  0xd3   : > { %v269_v24 = vadd.f32 %v268_v23, %v267_v22 }
  0xd5   : > { %524 = vrcp.f32 %v269_v24 }
  0xdf   : > { %v525_v25 = vpop.eup %524 }
  0xe0   : > { %v271_v26 = vmul.f32 %v525_v25, %v523_v17 }
  0xe2   : > { %274 = vperm.xlu0 %521, %v271_v26  }
 0x161   : > { %v275_v35 = vpop.permute.xlu0 %274 }
 0x162   : > { %v277_v36 = vmul.f32 %v275_v35, %v236_v1 }
 0x164   : > { %v278_v37 = vsel %vm245_vm0, %v277_v36, 0.0 }
 0x165   : > { %v279_v38 = vrot.slane %v278_v37, 4 }
 0x167   : > { %v280_v39 = vadd.f32 %v279_v38, %v278_v37 }
 0x169   : > { %v281_v40 = vrot.slane %v280_v39, 2 }
 0x16b   : > { %v282_v41 = vadd.f32 %v281_v40, %v280_v39 }
 0x16d   : > { %v283_v42 = vrot.slane %v282_v41, 1 }
 0x16f   : > { %v284_v43 = vadd.f32 %v283_v42, %v282_v41 }
 0x171   : > { %470 = vmatmul.mubr.msk.f32.vlgmr.msra.gmra.mrb[0].mxu0 %vm245_vm0, %v284_v43 }
 0x244   : > { %v359_v45 = vpop.f32.mrb[0].mxu0 }
 0x245   : > { %v360_v46 = vadd.f32 %v359_v45, %v289_v44  ;;  %v471_v47 = vpop.f32.mrb[1].mxu0 }
 0x247   : > { %364 = vst.msk [vmem:[%s227_s11] sm:$0x1] %vm363_vm4, %v360_v46 }
 0x248   : > { %539 = shalt.err (!%p536_p3)
}
 0x249   : > { %s540_s26 = scalar_lea.hbm %s707_s15, 16  ;;  %s544_s7 = scalar_lea.hbm %s754_s5, 32 }
 0x24a   : > { %p541_p4 = scmp.ne.s32.totalorder %s707_s15, %s540_s26  ;;  %p545_p9 = scmp.lt.u32.totalorder %s707_s15, %s754_s5 }
 0x24b   : > { %p546_p10 = scmp.lt.u32.totalorder %s544_s7, %s540_s26  ;;  %p548_p12 = scmp.lt.u32.totalorder %s540_s26, %s707_s15 }
 0x24c   : > { %p542_p7 = pnand %p541_p4, %p663_p5 }
 0x24d   : > { %p547_p11 = por %p546_p10, %p545_p9 }
 0x24e   : > { %p543_p8 = pneg %p542_p7 }
 0x24f   : > { %p549_p13 = por %p548_p12, %p547_p11 }
 0x251   : > { %p550_p0 = pnand %p549_p13, %p543_p8 }
 0x253   : > { %553 = shalt.err (!%p550_p0)
}
 0x254   : > { %478 = dma.vmem_to_hbm [thread:$0]  (%p663_p5), %s709_s12, 16, %s707_s15, %s366_s16  }
 0x255 PF: > { %p484_p1 = scmp.ge.s32.totalorder %s588_s21, 2  ;;  %s390_s10 = sand.u32 1, %s576_s18  }
 0x256   : > { %s391_s11 = scalar_lea.sflag [#allocation3], %s390_s10 }
 0x257   : > { %p481_p2 = pnand %p484_p1, %p667_p6 }
 0x259   : > { %571 = dma.done.wait (!%p481_p2), %s391_s11, 16  }
 0x25a   : > { %573 = vsyncadd (!%p481_p2), %s391_s11, 4294967280  ;;  %p15_p3 = scmp.ge.s32.totalorder %s650_s24, 4   ;;  %s757_s18 = smov %s580_s19 }
 0x25b   : > { %s758_s19 = smov %s584_s20  ;;  %s759_s20 = smov %s661_s27 }
 0x25c   : > { %s760_s21 = smov %s650_s24  ;;  %17 = sbr.rel (!%p15_p3) target bundleno = 3 (0x3), region = 78 }
 0x263   :  { %395 = vsyncpa [#allocation3], 1 }
 0x264   :  { %397 = vsyncpa [#allocation3 + $0x1], 1 }

</bundles_post_ra>
